<compile_context>
chip_gen: v6e
topology: v6e:2x2x1
jax: 0.10.0
libtpu: 0.0.40
codegen_flags: <defaults>
</compile_context>

<pallas_src>
import math
from functools import partial

import jax
import jax.numpy as jnp
from jax import lax
from jax.experimental import pallas as pl
from jax.experimental.pallas import tpu as pltpu


# ---------------------------------------------------------------------------
# Pass 1: Q/K/V projection (runs once per input row — no redundant recompute).
# ---------------------------------------------------------------------------
def _qkv_proj_kernel(x_ref, wqt_ref, bq_ref, wkt_ref, bk_ref, wvt_ref, bv_ref,
                     q_ref, k_ref, v_ref):
    x = x_ref[...]                                                   # (tr, D)
    q = (jnp.dot(x, wqt_ref[...], preferred_element_type=jnp.float32)
         + bq_ref[...].astype(jnp.float32))                          # pre-scaled
    k = (jnp.dot(x, wkt_ref[...], preferred_element_type=jnp.float32)
         + bk_ref[...].astype(jnp.float32))
    v = (jnp.dot(x, wvt_ref[...], preferred_element_type=jnp.float32)
         + bv_ref[...].astype(jnp.float32))
    q_ref[...] = q.astype(q_ref.dtype)
    k_ref[...] = k.astype(k_ref.dtype)
    v_ref[...] = v.astype(v_ref.dtype)


# ---------------------------------------------------------------------------
# Pass 2: flash attention over pre-projected, pre-scaled Q/K/V.
# ---------------------------------------------------------------------------
def _flash_attn_kernel(q_ref, k_ref, v_ref, o_ref, m_scr, l_scr, acc_scr, *,
                       out_d):
    ki = pl.program_id(2)

    @pl.when(ki == 0)
    def _init():
        m_scr[...] = jnp.full_like(m_scr, -jnp.inf)
        l_scr[...] = jnp.zeros_like(l_scr)
        acc_scr[...] = jnp.zeros_like(acc_scr)

    # q block index is invariant in ki -> the pipeline keeps it resident.
    q = q_ref[0]                                                     # (tq, Dp)
    k = k_ref[0]                                                     # (tk, Dp)

    # Scores: contract on the feature axis of both operands (no k transpose).
    s = lax.dot_general(q, k, dimension_numbers=(((1,), (1,)), ((), ())),
                        preferred_element_type=jnp.float32)          # (tq, tk)

    # Online (streaming) softmax update, f32 stats/accumulator.
    m_prev = m_scr[...]
    m_new = jnp.maximum(m_prev, jnp.max(s, axis=-1, keepdims=True))
    alpha = jnp.exp(m_prev - m_new)
    p = jnp.exp(s - m_new)
    l_scr[...] = alpha * l_scr[...] + jnp.sum(p, axis=-1, keepdims=True)
    acc_scr[...] = alpha * acc_scr[...] + jnp.dot(
        p.astype(v_ref.dtype), v_ref[0], preferred_element_type=jnp.float32)
    m_scr[...] = m_new

    @pl.when(ki == pl.num_programs(2) - 1)
    def _finalize():
        # Runs once per (b, q-tile): exact divide is free here and keeps
        # numerics closest to the reference.  Padded columns (>= out_d) are
        # exactly zero and are simply never stored.
        o_ref[0] = (acc_scr[:, :out_d] / l_scr[...]).astype(o_ref.dtype)


# ---------------------------------------------------------------------------
# Wrapper
# ---------------------------------------------------------------------------
def _pick_seq_tile(s, target):
    """Largest divisor of s that is <= target, preferring 256/128/16/8-aligned."""
    if s <= target:
        return s
    for align in (256, 128, 16, 8):
        t = (target // align) * align
        while t >= align:
            if s % t == 0:
                return t
            t -= align
    # TODO(synk): no aligned divisor (e.g. prime S) -> whole axis; a masked
    # tail-tile path would be needed for very long such sequences.
    return s


def _vmem_limit_bytes():
    # ~3/4 of physical VMEM: 96 MiB on v5e/v6e (128 MiB), 48 MiB on v7x (64 MiB).
    try:
        cap = pltpu.get_tpu_info().vmem_capacity_bytes
        if cap:
            return int(min(cap * 3 // 4, 100 * 1024 * 1024))
    except Exception:
        pass
    return 48 * 1024 * 1024


def self_attention(x, wq, bq, wk, bk, wv, bv, *, q_tile=256, kv_tile=256,
                   proj_tile=256):
    """x: (B, S, D); weights: (D, D) in nn.Linear (out, in) layout; biases: (D,)."""
    B, S, D = x.shape
    cdt = x.dtype
    scale = 1.0 / math.sqrt(D)

    # Lane-dense projected feature dim (zero weight columns are exact: they add
    # nothing to q.k^T and yield zero output columns that are never stored).
    Dp = max(128, ((D + 127) // 128) * 128)

    # Hoist weight transposes + fold the 1/sqrt(D) scale into Wq / bq.
    wqt = (wq * scale).T.astype(cdt)        # (D_in, D_out)
    wkt = wk.T.astype(cdt)
    wvt = wv.T.astype(cdt)
    bqs = (bq * scale).reshape(1, D).astype(cdt)
    bk2 = bk.reshape(1, D).astype(cdt)
    bv2 = bv.reshape(1, D).astype(cdt)
    if Dp != D:
        pad = Dp - D
        wqt = jnp.pad(wqt, ((0, 0), (0, pad)))
        wkt = jnp.pad(wkt, ((0, 0), (0, pad)))
        wvt = jnp.pad(wvt, ((0, 0), (0, pad)))
        bqs = jnp.pad(bqs, ((0, 0), (0, pad)))
        bk2 = jnp.pad(bk2, ((0, 0), (0, pad)))
        bv2 = jnp.pad(bv2, ((0, 0), (0, pad)))

    vmem_limit = _vmem_limit_bytes()

    # ---- Pass 1: Q/K/V projection over flattened rows (x stays unpadded). ----
    R = B * S
    x2 = x.reshape(R, D)
    tr = _pick_seq_tile(R, proj_tile)
    nr = R // tr

    w_spec = pl.BlockSpec((D, Dp), lambda r: (0, 0))
    b_spec = pl.BlockSpec((1, Dp), lambda r: (0, 0))
    row_in = pl.BlockSpec((tr, D), lambda r: (r, 0))
    row_out = pl.BlockSpec((tr, Dp), lambda r: (r, 0))

    q2, k2, v2 = pl.pallas_call(
        _qkv_proj_kernel,
        out_shape=(jax.ShapeDtypeStruct((R, Dp), cdt),) * 3,
        grid_spec=pltpu.PrefetchScalarGridSpec(
            num_scalar_prefetch=0,
            grid=(nr,),
            in_specs=[row_in, w_spec, b_spec, w_spec, b_spec, w_spec, b_spec],
            out_specs=[row_out, row_out, row_out],
        ),
        compiler_params=pltpu.CompilerParams(
            dimension_semantics=("parallel",),
            vmem_limit_bytes=vmem_limit,
        ),
    )(x2, wqt, bqs, wkt, bk2, wvt, bv2)

    q3 = q2.reshape(B, S, Dp)
    k3 = k2.reshape(B, S, Dp)
    v3 = v2.reshape(B, S, Dp)

    # ---- Pass 2: flash attention.  grid = (B, q-tiles, kv-tiles). ----
    tq = _pick_seq_tile(S, q_tile)
    tk = _pick_seq_tile(S, kv_tile)
    nq, nk = S // tq, S // tk

    out = pl.pallas_call(
        partial(_flash_attn_kernel, out_d=D),
        out_shape=jax.ShapeDtypeStruct((B, S, D), cdt),   # unpadded output
        grid_spec=pltpu.PrefetchScalarGridSpec(
            num_scalar_prefetch=0,
            grid=(B, nq, nk),
            in_specs=[
                pl.BlockSpec((1, tq, Dp), lambda b, qi, ki: (b, qi, 0)),  # Q
                pl.BlockSpec((1, tk, Dp), lambda b, qi, ki: (b, ki, 0)),  # K
                pl.BlockSpec((1, tk, Dp), lambda b, qi, ki: (b, ki, 0)),  # V
            ],
            out_specs=pl.BlockSpec((1, tq, D), lambda b, qi, ki: (b, qi, 0)),
            scratch_shapes=[
                pltpu.VMEM((tq, 1), jnp.float32),    # running row max m
                pltpu.VMEM((tq, 1), jnp.float32),    # running denom l
                pltpu.VMEM((tq, Dp), jnp.float32),   # output accumulator
            ],
        ),
        compiler_params=pltpu.CompilerParams(
            dimension_semantics=("parallel", "parallel", "arbitrary"),
            vmem_limit_bytes=vmem_limit,
        ),
    )(q3, k3, v3)

    return out


def self_attention_ref(x, wq, bq, wk, bk, wv, bv):
    """Pure-JAX reference matching the PyTorch module semantics."""
    q = x @ wq.T + bq
    k = x @ wk.T + bk
    v = x @ wv.T + bv
    scores = jnp.matmul(q, jnp.swapaxes(k, -2, -1)) / jnp.sqrt(
        jnp.asarray(x.shape[-1], jnp.float32))
    attn = jax.nn.softmax(scores, axis=-1)
    return jnp.matmul(attn, v)


if __name__ == "__main__":
    B, S, D = 2, 8, 32
    key = jax.random.PRNGKey(0)
    kx, kwq, kbq, kwk, kbk, kwv, kbv = jax.random.split(key, 7)

    # Deterministic parameter init mimicking nn.Linear's U(-1/sqrt(D), 1/sqrt(D)).
    bound = 1.0 / math.sqrt(D)
    x = jax.random.normal(kx, (B, S, D), dtype=jnp.float32)
    wq = jax.random.uniform(kwq, (D, D), minval=-bound, maxval=bound, dtype=jnp.float32)
    bq = jax.random.uniform(kbq, (D,), minval=-bound, maxval=bound, dtype=jnp.float32)
    wk = jax.random.uniform(kwk, (D, D), minval=-bound, maxval=bound, dtype=jnp.float32)
    bk = jax.random.uniform(kbk, (D,), minval=-bound, maxval=bound, dtype=jnp.float32)
    wv = jax.random.uniform(kwv, (D, D), minval=-bound, maxval=bound, dtype=jnp.float32)
    bv = jax.random.uniform(kbv, (D,), minval=-bound, maxval=bound, dtype=jnp.float32)

    out = self_attention(x, wq, bq, wk, bk, wv, bv)
    out = jax.block_until_ready(out)

    ref = self_attention_ref(x, wq, bq, wk, bk, wv, bv)
    assert out.shape == (B, S, D)
    # Reordered f32 accumulation (online softmax) -> slightly loosened tolerance.
    assert jnp.allclose(out, ref, atol=5e-3, rtol=5e-3), "mismatch vs reference"

    print("KERNEL_OK")
</pallas_src>

<mosaic_0001>
module attributes {stable_mosaic.version = 11 : i64} {
  func.func @_qkv_proj_kernel(%arg0: i32, %arg1: memref<16x32xf32, #tpu.memory_space<vmem>>, %arg2: memref<32x128xf32, #tpu.memory_space<vmem>>, %arg3: memref<1x128xf32, #tpu.memory_space<vmem>>, %arg4: memref<32x128xf32, #tpu.memory_space<vmem>>, %arg5: memref<1x128xf32, #tpu.memory_space<vmem>>, %arg6: memref<32x128xf32, #tpu.memory_space<vmem>>, %arg7: memref<1x128xf32, #tpu.memory_space<vmem>>, %arg8: memref<16x128xf32, #tpu.memory_space<vmem>>, %arg9: memref<16x128xf32, #tpu.memory_space<vmem>>, %arg10: memref<16x128xf32, #tpu.memory_space<vmem>>) attributes {dimension_semantics = [#tpu.dimension_semantics<parallel>], iteration_bounds = array<i64: 1>, scalar_prefetch = 0 : i64, scratch_operands = 0 : i64, tpu.core_type = #tpu.core_type<tc>, window_params = [{transform_indices = @transform_0, window_bounds = array<i64: 16, 32>}, {pipeline_mode = #tpu.pipeline_mode<synchronous>, transform_indices = @transform_1, window_bounds = array<i64: 32, 128>}, {pipeline_mode = #tpu.pipeline_mode<synchronous>, transform_indices = @transform_2, window_bounds = array<i64: 1, 128>}, {pipeline_mode = #tpu.pipeline_mode<synchronous>, transform_indices = @transform_3, window_bounds = array<i64: 32, 128>}, {pipeline_mode = #tpu.pipeline_mode<synchronous>, transform_indices = @transform_4, window_bounds = array<i64: 1, 128>}, {pipeline_mode = #tpu.pipeline_mode<synchronous>, transform_indices = @transform_5, window_bounds = array<i64: 32, 128>}, {pipeline_mode = #tpu.pipeline_mode<synchronous>, transform_indices = @transform_6, window_bounds = array<i64: 1, 128>}, {transform_indices = @transform_7, window_bounds = array<i64: 16, 128>}, {transform_indices = @transform_8, window_bounds = array<i64: 16, 128>}, {transform_indices = @transform_9, window_bounds = array<i64: 16, 128>}]} {
    %c0 = arith.constant 0 : index
    %c0_0 = arith.constant 0 : index
    %0 = vector.load %arg1[%c0, %c0_0] : memref<16x32xf32, #tpu.memory_space<vmem>>, vector<16x32xf32>
    %c0_1 = arith.constant 0 : index
    %c0_2 = arith.constant 0 : index
    %1 = vector.load %arg2[%c0_1, %c0_2] : memref<32x128xf32, #tpu.memory_space<vmem>>, vector<32x128xf32>
    %cst = arith.constant dense<0.000000e+00> : vector<16x128xf32>
    %2 = tpu.matmul %0, %1, %cst {dimension_numbers = #tpu.dot_dimension_numbers<[1], [0], [0], [1], [0, 0, 1, 1], [], []>} : vector<16x32xf32>, vector<32x128xf32>, vector<16x128xf32> -> vector<16x128xf32>
    %c0_3 = arith.constant 0 : index
    %c0_4 = arith.constant 0 : index
    %3 = vector.load %arg3[%c0_3, %c0_4] : memref<1x128xf32, #tpu.memory_space<vmem>>, vector<1x128xf32>
    %4 = vector.broadcast %3 : vector<1x128xf32> to vector<16x128xf32>
    %5 = arith.addf %2, %4 : vector<16x128xf32>
    %c0_5 = arith.constant 0 : index
    %c0_6 = arith.constant 0 : index
    %6 = vector.load %arg4[%c0_5, %c0_6] : memref<32x128xf32, #tpu.memory_space<vmem>>, vector<32x128xf32>
    %cst_7 = arith.constant dense<0.000000e+00> : vector<16x128xf32>
    %7 = tpu.matmul %0, %6, %cst_7 {dimension_numbers = #tpu.dot_dimension_numbers<[1], [0], [0], [1], [0, 0, 1, 1], [], []>} : vector<16x32xf32>, vector<32x128xf32>, vector<16x128xf32> -> vector<16x128xf32>
    %c0_8 = arith.constant 0 : index
    %c0_9 = arith.constant 0 : index
    %8 = vector.load %arg5[%c0_8, %c0_9] : memref<1x128xf32, #tpu.memory_space<vmem>>, vector<1x128xf32>
    %9 = vector.broadcast %8 : vector<1x128xf32> to vector<16x128xf32>
    %10 = arith.addf %7, %9 : vector<16x128xf32>
    %c0_10 = arith.constant 0 : index
    %c0_11 = arith.constant 0 : index
    %11 = vector.load %arg6[%c0_10, %c0_11] : memref<32x128xf32, #tpu.memory_space<vmem>>, vector<32x128xf32>
    %cst_12 = arith.constant dense<0.000000e+00> : vector<16x128xf32>
    %12 = tpu.matmul %0, %11, %cst_12 {dimension_numbers = #tpu.dot_dimension_numbers<[1], [0], [0], [1], [0, 0, 1, 1], [], []>} : vector<16x32xf32>, vector<32x128xf32>, vector<16x128xf32> -> vector<16x128xf32>
    %c0_13 = arith.constant 0 : index
    %c0_14 = arith.constant 0 : index
    %13 = vector.load %arg7[%c0_13, %c0_14] : memref<1x128xf32, #tpu.memory_space<vmem>>, vector<1x128xf32>
    %14 = vector.broadcast %13 : vector<1x128xf32> to vector<16x128xf32>
    %15 = arith.addf %12, %14 : vector<16x128xf32>
    %c0_15 = arith.constant 0 : index
    %c0_16 = arith.constant 0 : index
    %16 = vector.load %arg8[%c0_15, %c0_16] : memref<16x128xf32, #tpu.memory_space<vmem>>, vector<16x128xf32>
    tpu.vector_store %arg8[%c0_15, %c0_16], %5 {strides = array<i32>} : memref<16x128xf32, #tpu.memory_space<vmem>>, vector<16x128xf32>,
    %c0_17 = arith.constant 0 : index
    %c0_18 = arith.constant 0 : index
    %17 = vector.load %arg9[%c0_17, %c0_18] : memref<16x128xf32, #tpu.memory_space<vmem>>, vector<16x128xf32>
    tpu.vector_store %arg9[%c0_17, %c0_18], %10 {strides = array<i32>} : memref<16x128xf32, #tpu.memory_space<vmem>>, vector<16x128xf32>,
    %c0_19 = arith.constant 0 : index
    %c0_20 = arith.constant 0 : index
    %18 = vector.load %arg10[%c0_19, %c0_20] : memref<16x128xf32, #tpu.memory_space<vmem>>, vector<16x128xf32>
    tpu.vector_store %arg10[%c0_19, %c0_20], %15 {strides = array<i32>} : memref<16x128xf32, #tpu.memory_space<vmem>>, vector<16x128xf32>,
    return
  }
  func.func @transform_0(%arg0: i32) -> (i32, i32) {
    %c0_i32 = arith.constant 0 : i32
    %c0_i32_0 = arith.constant 0 : i32
    return %arg0, %c0_i32 : i32, i32
  }
  func.func @transform_1(%arg0: i32) -> (i32, i32) {
    %c0_i32 = arith.constant 0 : i32
    %c0_i32_0 = arith.constant 0 : i32
    %c0_i32_1 = arith.constant 0 : i32
    return %c0_i32, %c0_i32_0 : i32, i32
  }
  func.func @transform_2(%arg0: i32) -> (i32, i32) {
    %c0_i32 = arith.constant 0 : i32
    %c0_i32_0 = arith.constant 0 : i32
    %c0_i32_1 = arith.constant 0 : i32
    return %c0_i32, %c0_i32_0 : i32, i32
  }
  func.func @transform_3(%arg0: i32) -> (i32, i32) {
    %c0_i32 = arith.constant 0 : i32
    %c0_i32_0 = arith.constant 0 : i32
    %c0_i32_1 = arith.constant 0 : i32
    return %c0_i32, %c0_i32_0 : i32, i32
  }
  func.func @transform_4(%arg0: i32) -> (i32, i32) {
    %c0_i32 = arith.constant 0 : i32
    %c0_i32_0 = arith.constant 0 : i32
    %c0_i32_1 = arith.constant 0 : i32
    return %c0_i32, %c0_i32_0 : i32, i32
  }
  func.func @transform_5(%arg0: i32) -> (i32, i32) {
    %c0_i32 = arith.constant 0 : i32
    %c0_i32_0 = arith.constant 0 : i32
    %c0_i32_1 = arith.constant 0 : i32
    return %c0_i32, %c0_i32_0 : i32, i32
  }
  func.func @transform_6(%arg0: i32) -> (i32, i32) {
    %c0_i32 = arith.constant 0 : i32
    %c0_i32_0 = arith.constant 0 : i32
    %c0_i32_1 = arith.constant 0 : i32
    return %c0_i32, %c0_i32_0 : i32, i32
  }
  func.func @transform_7(%arg0: i32) -> (i32, i32) {
    %c0_i32 = arith.constant 0 : i32
    %c0_i32_0 = arith.constant 0 : i32
    return %arg0, %c0_i32 : i32, i32
  }
  func.func @transform_8(%arg0: i32) -> (i32, i32) {
    %c0_i32 = arith.constant 0 : i32
    %c0_i32_0 = arith.constant 0 : i32
    return %arg0, %c0_i32 : i32, i32
  }
  func.func @transform_9(%arg0: i32) -> (i32, i32) {
    %c0_i32 = arith.constant 0 : i32
    %c0_i32_0 = arith.constant 0 : i32
    return %arg0, %c0_i32 : i32, i32
  }
}

</mosaic_0001>

<bundles_post_ra>
// kernel: tpu_custom_call.1
= control target key start
LH: loop header
LB: loop body
LE: loop exit
PB: predicated region body
PF: predicated region fallthrough
CT: control target
= control target key end

     0   :  { %15 = vsyncpa [#allocation3], 0  ;;  %s744_s0 = inlined_call_operand.hbm [shape: f32[16,32], index: 0, kind: input, shape index: {}]   ;;  %s745_s1 = inlined_call_operand.hbm [shape: f32[32,128], index: 1, kind: input, shape index: {}]   ;;  %s746_s2 = inlined_call_operand.vmem [shape: f32[1,128], index: 2, kind: input, shape index: {}]   ;;  %s747_s3 = inlined_call_operand.hbm [shape: f32[32,128], index: 3, kind: input, shape index: {}]   ;;  %s748_s4 = inlined_call_operand.vmem [shape: f32[1,128], index: 4, kind: input, shape index: {}]   ;;  %s749_s5 = inlined_call_operand.hbm [shape: f32[32,128], index: 5, kind: input, shape index: {}]   ;;  %s750_s6 = inlined_call_operand.vmem [shape: f32[1,128], index: 6, kind: input, shape index: {}]   ;;  %s751_s7 = inlined_call_operand.hbm [shape: f32[16,128], index: 7, kind: output, shape index: {0}]   ;;  %s752_s8 = inlined_call_operand.hbm [shape: f32[16,128], index: 8, kind: output, shape index: {1}]   ;;  %s753_s9 = inlined_call_operand.hbm [shape: f32[16,128], index: 9, kind: output, shape index: {2}]  }
   0x1   :  { %16 = vsyncpa [#allocation6], 0 }
   0x2   :  { %17 = vsyncpa [#allocation9], 0 }
   0x3   :  { %18 = vsyncpa [#allocation4], 0 }
   0x4   :  { %19 = vsyncpa [#allocation12], 0  ;;  %s628_s30 = smov [#allocation5]   ;;  %s629_s11 = smov [#allocation2]  }
   0x5   :  { %s37_s10 = sshll.u32 %s628_s30, 4  ;;  %s25_s12 = sshll.u32 %s629_s11, 4  ;;  %s38_s10 = int_to_ptr.vmem [resolvable:$true] %s37_s10  ;;  %s26_s12 = int_to_ptr.vmem [resolvable:$true] %s25_s12 }
   0x6   :  { %s486_s13 = scalar_lea.vmem %s38_s10, 512  ;;  %p491_p1 = scmp.lt.s32.totalorder %s38_s10, %s38_s10 }
   0x7   :  { %p487_p0 = scmp.ne.s32.totalorder %s38_s10, %s486_s13  ;;  %p492_p2 = scmp.lt.s32.totalorder %s486_s13, %s486_s13 }
   0x9   :  { %p493_p3 = por %p492_p2, %p491_p1 }
   0xb   :  { %p494_p4 = pnand %p493_p3, %p487_p0 }
   0xd   :  { %497 = shalt.err (!%p494_p4)
}
   0xe   :  { %s630_s14 = smov 128   ;;  %s631_s15 = smov 8  }
   0xf   :  { %43 = dma.hbm_to_vmem [thread:$0]  %s745_s1, 512, %s38_s10, [#allocation6], %s630_s14, %s630_s14, %s631_s15  }
  0x10   :  { %s506_s18 = scalar_lea.vmem %s26_s12, 256  ;;  %p511_p6 = scmp.lt.s32.totalorder %s26_s12, %s26_s12 }
  0x11   :  { %p507_p5 = scmp.ne.s32.totalorder %s26_s12, %s506_s18  ;;  %p512_p7 = scmp.lt.s32.totalorder %s506_s18, %s506_s18 }
  0x13   :  { %p513_p8 = por %p512_p7, %p511_p6 }
  0x15   :  { %p514_p9 = pnand %p513_p8, %p507_p5 }
  0x17   :  { %517 = shalt.err (!%p514_p9)
}
  0x18   :  { %31 = dma.hbm_to_vmem [thread:$0]  %s744_s0, 256, %s26_s12, [#allocation3], %s630_s14, %s630_s14, %s631_s15  }
  0x19   :  { %s632_s21 = smov [#allocation7]   ;;  %s633_s23 = smov [#allocation8]  }
  0x1a   :  { %s51_s22 = sshll.u32 %s632_s21, 4  ;;  %s65_s24 = sshll.u32 %s633_s23, 4  ;;  %s52_s22 = int_to_ptr.vmem [resolvable:$true] %s51_s22  ;;  %s66_s24 = int_to_ptr.vmem [resolvable:$true] %s65_s24 }
  0x1b   :  { %s526_s1 = scalar_lea.vmem %s52_s22, 512  ;;  %p531_p11 = scmp.lt.s32.totalorder %s52_s22, %s52_s22 }
  0x1c   :  { %p527_p10 = scmp.ne.s32.totalorder %s52_s22, %s526_s1  ;;  %p532_p12 = scmp.lt.s32.totalorder %s526_s1, %s526_s1 }
  0x1e   :  { %p533_p13 = por %p532_p12, %p531_p11 }
  0x20   :  { %p534_p0 = pnand %p533_p13, %p527_p10 }
  0x22   :  { %537 = shalt.err (!%p534_p0)
}
  0x23   :  { %57 = dma.hbm_to_vmem [thread:$0]  %s747_s3, 512, %s52_s22, [#allocation6], %s630_s14, %s630_s14, %s631_s15  }
  0x24   :  { %s546_s0 = scalar_lea.vmem %s66_s24, 512  ;;  %p551_p2 = scmp.lt.s32.totalorder %s66_s24, %s66_s24 }
  0x25   :  { %p547_p1 = scmp.ne.s32.totalorder %s66_s24, %s546_s0  ;;  %p552_p3 = scmp.lt.s32.totalorder %s546_s0, %s546_s0 }
  0x27   :  { %p553_p4 = por %p552_p3, %p551_p2 }
  0x29   :  { %p554_p5 = pnand %p553_p4, %p547_p1 }
  0x2b   :  { %557 = shalt.err (!%p554_p5)
}
  0x2c   :  { %71 = dma.hbm_to_vmem [thread:$0]  %s749_s5, 512, %s66_s24, [#allocation9], %s630_s14, %s630_s14, %s631_s15  }
  0x2d   :  { %618 = dma.done.wait [#allocation3], 256  }
  0x2e   :  { %619 = vsyncadd [#allocation3], 4294967040 }
  0x2f   :  { %620 = dma.done.wait [#allocation6], 1024  }
  0x30   :  { %621 = vsyncadd [#allocation6], 4294966272 }
  0x31   :  { %622 = dma.done.wait [#allocation9], 512  }
  0x32   :  { %623 = vsyncadd [#allocation9], 4294966784  ;;  %v91_v0 = vld [vmem:[#allocation5 + $0x18] sm:$0xff]  ;;  %v90_v1 = vld [vmem:[#allocation5 + $0x10] sm:$0xff]  ;;  %vm99_vm0 = vcmask 261120   ;;  %s634_s29 = smov [#allocation10]  }
  0x33   :  { %436 = vmatprep.subr.mxu0 %v91_v0  ;;  %v184_v2 = vld [vmem:[#allocation7 + $0x18] sm:$0xff]  ;;  %v86_v3 = vld [vmem:[#allocation2] sm:$0xff]  ;;  %v89_v4 = vld [vmem:[#allocation5 + $0x8] sm:$0xff]  ;;  %s364_s30 = sshll.u32 %s634_s29, 4  ;;  %s635_s12 = smov [#allocation11]   ;;  %s365_s30 = int_to_ptr.vmem [resolvable:$true] %s364_s30 }
  0x34   :  { %437 = vmatpush3.msra.mxu0 %v91_v0  ;;  %447 = vmatprep.subr.mxu1 %v184_v2  ;;  %v183_v5 = vld [vmem:[#allocation7 + $0x10] sm:$0xff]  ;;  %v88_v6 = vld [vmem:[#allocation5] sm:$0xff]  ;;  %v182_v7 = vld [vmem:[#allocation7 + $0x8] sm:$0xff]  ;;  %s376_s13 = sshll.u32 %s635_s12, 4  ;;  %p563_p7 = scmp.lt.s32.totalorder %s365_s30, %s365_s30  ;;  %s377_s13 = int_to_ptr.vmem [resolvable:$true] %s376_s13 }
  0x35   :  { %438 = vmatprep.subr.mxu0 %v90_v1  ;;  %448 = vmatpush3.msra.mxu1 %v184_v2  ;;  %v87_v8 = vld [vmem:[#allocation2 + $0x8] sm:$0xff]  ;;  %v181_v10 = vld [vmem:[#allocation7] sm:$0xff]  ;;  %v269_v11 = vld [vmem:[#allocation8 + $0x10] sm:$0xff] }
  0x36   :  { %439 = vmatpush3.msra.mxu0 %v90_v1  ;;  %444 = vmatprep.mubr.msk.f32.mxu0 %vm99_vm0, %v86_v3  ;;  %v270_v9 = vld [vmem:[#allocation8 + $0x18] sm:$0xff]  ;;  %v268_v12 = vld [vmem:[#allocation8 + $0x8] sm:$0xff]  ;;  %v267_v13 = vld [vmem:[#allocation8] sm:$0xff] }
  0x37   :  { %440 = vmatprep.subr.mxu0 %v89_v4  ;;  %449 = vmatprep.subr.mxu1 %v183_v5  ;;  %v409_v14 = vld [vmem:[%s746_s2] ss:$0 sm:$0xff]  ;;  %s558_s2 = scalar_lea.vmem %s365_s30, 256 }
  0x38   :  { %441 = vmatpush3.msra.mxu0 %v89_v4  ;;  %450 = vmatpush3.msra.mxu1 %v183_v5  ;;  %v412_v18 = vld [vmem:[%s748_s4] ss:$0 sm:$0xff]  ;;  %p559_p6 = scmp.ne.s32.totalorder %s365_s30, %s558_s2  ;;  %p564_p8 = scmp.lt.s32.totalorder %s558_s2, %s558_s2 }
  0x39   :  { %442 = vmatprep.subr.mxu0 %v88_v6  ;;  %451 = vmatprep.subr.mxu1 %v182_v7  ;;  %v415_v22 = vld [vmem:[%s750_s6] ss:$0 sm:$0xff] }
  0x3a   :  { %443 = vmatpush3.msra.mxu0 %v88_v6  ;;  %452 = vmatpush3.msra.mxu1 %v182_v7  ;;  %p565_p9 = por %p564_p8, %p563_p7 }
  0x3b   :  { %445 = vmatmul.mubr.msk.f32.vlgmr.msra.gmra.mxu0 %vm99_vm0, %v87_v8  ;;  %458 = vmatprep.subr.mxu0 %v270_v9 }
  0x3c   :  { %459 = vmatpush3.msra.mxu0 %v270_v9  ;;  %453 = vmatprep.subr.mxu1 %v181_v10  ;;  %p566_p10 = pnand %p565_p9, %p559_p6 }
  0x3d   :  { %460 = vmatprep.subr.mxu0 %v269_v11  ;;  %454 = vmatpush3.msra.mxu1 %v181_v10 }
  0x3e   :  { %461 = vmatpush3.msra.mxu0 %v269_v11  ;;  %455 = vmatprep.mubr.msk.f32.mxu1 %vm99_vm0, %v86_v3 }
  0x3f   :  { %462 = vmatprep.subr.mxu0 %v268_v12  ;;  %456 = vmatmul.mubr.msk.f32.vlgmr.msra.gmra.mxu1 %vm99_vm0, %v87_v8 }
  0x40   :  { %463 = vmatpush3.msra.mxu0 %v268_v12  ;;  %466 = vmatprep.mubr.msk.f32.mxu0 %vm99_vm0, %v86_v3 }
  0x41   :  { %464 = vmatprep.subr.mxu0 %v267_v13 }
  0x42   :  { %465 = vmatpush3.msra.mxu0 %v267_v13 }
  0x43   :  { %467 = vmatmul.mubr.msk.f32.vlgmr.msra.gmra.mxu0 %vm99_vm0, %v87_v8 }
  0xfb   :  { %v446_v15 = vpop.f32.mrf.mxu0 }
  0xfc   :  { %v178_v16 = vadd.f32 %v446_v15, %v409_v14 }
  0xfd   :  { %v172_v17 = vpop.f32.mrf.mxu0 }
  0xfe   :  { %354 = vst [vmem:[#allocation10 + $0x8] sm:$0xff] %v178_v16  ;;  %v173_v19 = vadd.f32 %v409_v14, %v172_v17 }
  0xff   :  { %v457_v20 = vpop.f32.mrf.mxu1 }
 0x100   :  { %353 = vst [vmem:[#allocation10] sm:$0xff] %v173_v19  ;;  %v264_v21 = vadd.f32 %v457_v20, %v412_v18 }
 0x101   :  { %v258_v23 = vpop.f32.mrf.mxu1 }
 0x102   :  { %569 = shalt.err (!%p566_p10)
}
 0x103   :  { %370 = dma.vmem_to_hbm [thread:$0]  %s365_s30, 256, %s751_s7, [#allocation4], %s630_s14, %s630_s14, %s631_s15   ;;  %356 = vst [vmem:[#allocation11 + $0x8] sm:$0xff] %v264_v21  ;;  %v259_v24 = vadd.f32 %v412_v18, %v258_v23  ;;  %v468_v25 = vpop.f32.mrf.mxu0 }
 0x104   :  { %s636_s6 = smov [#allocation13]   ;;  %v350_v26 = vadd.f32 %v468_v25, %v415_v22  ;;  %s578_s20 = scalar_lea.vmem %s377_s13, 256 }
 0x105   :  { %s388_s19 = sshll.u32 %s636_s6, 4  ;;  %355 = vst [vmem:[#allocation11] sm:$0xff] %v259_v24  ;;  %v344_v27 = vpop.f32.mrf.mxu0  ;;  %p579_p11 = scmp.ne.s32.totalorder %s377_s13, %s578_s20  ;;  %s389_s19 = int_to_ptr.vmem [resolvable:$true] %s388_s19 }
 0x106   :  { %p583_p12 = scmp.lt.s32.totalorder %s377_s13, %s377_s13  ;;  %p584_p13 = scmp.lt.s32.totalorder %s578_s20, %s578_s20 }
 0x108   :  { %p585_p0 = por %p584_p13, %p583_p12 }
 0x10a   :  { %p586_p1 = pnand %p585_p0, %p579_p11 }
 0x10c   :  { %589 = shalt.err (!%p586_p1)
}
 0x10d   :  { %382 = dma.vmem_to_hbm [thread:$0]  %s377_s13, 256, %s752_s8, [#allocation12], %s630_s14, %s630_s14, %s631_s15   ;;  %358 = vst [vmem:[#allocation13 + $0x8] sm:$0xff] %v350_v26  ;;  %v345_v28 = vadd.f32 %v415_v22, %v344_v27 }
 0x10e   :  { %s598_s22 = scalar_lea.vmem %s389_s19, 256  ;;  %p603_p3 = scmp.lt.s32.totalorder %s389_s19, %s389_s19 }
 0x10f   :  { %357 = vst [vmem:[#allocation13] sm:$0xff] %v345_v28  ;;  %p599_p2 = scmp.ne.s32.totalorder %s389_s19, %s598_s22  ;;  %p604_p4 = scmp.lt.s32.totalorder %s598_s22, %s598_s22 }
 0x111   :  { %p605_p5 = por %p604_p4, %p603_p3 }
 0x113   :  { %p606_p6 = pnand %p605_p5, %p599_p2 }
 0x115   :  { %609 = shalt.err (!%p606_p6)
}
 0x116   :  { %394 = dma.vmem_to_hbm [thread:$0]  %s389_s19, 256, %s753_s9, [#allocation12], %s630_s14, %s630_s14, %s631_s15  }
 0x117   :  { %624 = dma.done.wait [#allocation4], 256  }
 0x118   :  { %625 = vsyncadd [#allocation4], 4294967040 }
 0x119   :  { %626 = dma.done.wait [#allocation12], 512  }
 0x11a   :  { %627 = vsyncadd [#allocation12], 4294966784 }
 0x11b   :  { %404 = vsyncpa [#allocation3], 1 }
 0x11c   :  { %405 = vsyncpa [#allocation6], 1 }
 0x11d   :  { %406 = vsyncpa [#allocation9], 1 }
 0x11e   :  { %407 = vsyncpa [#allocation4], 1 }
 0x11f   :  { %408 = vsyncpa [#allocation12], 1 }

</bundles_post_ra>
